<compile_context>
chip_gen: v7x
topology: tpu7x:2x2x1
jax: 0.10.0
libtpu: 0.0.40
codegen_flags: <defaults>
</compile_context>

<pallas_src>
import jax
import jax.numpy as jnp
from jax.experimental import pallas as pl
from jax.experimental.pallas import tpu as pltpu


def _pw_kernel_vpu(x_ref, w_ref, o_ref):
    # x_ref: (C_in, TM)  w_ref: (C_out, C_in)  o_ref: (C_out, TM)
    # out[co, :] = sum_ci w[co, ci] * x[ci, :]  as VPU broadcast-FMAs
    # (lane-dense across the M axis; contraction dim is tiny so MXU is skipped).
    x = x_ref[...].astype(jnp.float32)
    w = w_ref[...].astype(jnp.float32)
    c_in = x.shape[0]
    acc = w[:, 0:1] * x[0:1, :]          # (C_out, TM)
    for ci in range(1, c_in):
        acc = acc + w[:, ci:ci + 1] * x[ci:ci + 1, :]
    o_ref[...] = acc.astype(o_ref.dtype)


def _pw_kernel_mxu(x_ref, w_ref, o_ref):
    # Larger channel counts: plain MXU matmul, f32 accumulation.
    o_ref[...] = jnp.dot(
        w_ref[...], x_ref[...], preferred_element_type=jnp.float32
    ).astype(o_ref.dtype)


def _pick_tile(m, c_in, c_out, tm_req, itemsize):
    """Lane-dim tile: multiple of 128 (or full extent), sized to a conservative
    VMEM budget (double-buffered x/out blocks + resident weight) that fits the
    default scoped VMEM on every generation, incl. v7x's 64 MiB physical."""
    if m <= tm_req:
        return m                      # single block covering the full extent
    tm = max(128, (tm_req // 128) * 128)
    budget = 16 * 1024 * 1024         # well under 32 MiB default scoped VMEM
    while tm > 128 and (2 * tm * (c_in + c_out) + c_in * c_out) * itemsize > budget:
        tm -= 128
    return tm


def pointwise_conv(x, weight, stride=1, *, tm=2048):
    """x: (N, C_in, H, W); weight: (C_out, C_in, 1, 1); no bias.
    Matches PyTorch nn.Conv2d(C_in, C_out, kernel_size=1, stride=stride, bias=False)."""
    n, c_in, h, w = x.shape
    c_out = weight.shape[0]

    if stride != 1:
        # TODO(synk): fuse this strided subsample into the kernel (strided pl.ds
        # loads / manual DMA) to avoid one extra HBM pass when stride > 1.
        x = x[:, :, ::stride, ::stride]
    ho, wo = x.shape[2], x.shape[3]
    m = ho * wo

    # NCHW kept as-is: (N, C_in, H*W) is a free, contiguous reshape.
    x3d = x.reshape(n, c_in, m)
    w2d = weight.reshape(c_out, c_in)

    itemsize = jnp.dtype(x.dtype).itemsize
    tm_eff = _pick_tile(m, c_in, c_out, tm, itemsize)
    grid = (n, pl.cdiv(m, tm_eff))

    kernel = _pw_kernel_vpu if c_in <= 16 else _pw_kernel_mxu

    cost = pl.CostEstimate(
        flops=2 * n * m * c_in * c_out,
        transcendentals=0,
        bytes_accessed=itemsize * (n * m * c_in + c_in * c_out + n * m * c_out),
    )

    out3d = pl.pallas_call(
        kernel,
        out_shape=jax.ShapeDtypeStruct((n, c_out, m), x.dtype),
        grid_spec=pltpu.PrefetchScalarGridSpec(
            num_scalar_prefetch=0,
            grid=grid,
            in_specs=[
                # (batch squeezed, full C_in, lane-dense M tile)
                pl.BlockSpec((None, c_in, tm_eff), lambda b, i: (b, 0, i)),
                # small weight, resident across the whole grid
                pl.BlockSpec((c_out, c_in), lambda b, i: (0, 0)),
            ],
            out_specs=pl.BlockSpec((None, c_out, tm_eff), lambda b, i: (b, 0, i)),
        ),
        compiler_params=pltpu.CompilerParams(
            dimension_semantics=("parallel", "parallel"),
        ),
        cost_estimate=cost,
    )(x3d, w2d)

    # (N, C_out, Ho*Wo) -> (N, C_out, Ho, Wo): free reshape, no transpose.
    return out3d.reshape(n, c_out, ho, wo)


if __name__ == "__main__":
    key = jax.random.PRNGKey(0)
    kx, kw = jax.random.split(key)

    N, C_IN, H, W = 2, 4, 16, 16
    C_OUT = 8
    STRIDE = 2

    x = jax.random.normal(kx, (N, C_IN, H, W), dtype=jnp.float32)
    # Conv2d(in, out, kernel_size=1, bias=False) weight shape: (C_out, C_in, 1, 1)
    weight = jax.random.normal(kw, (C_OUT, C_IN, 1, 1), dtype=jnp.float32) * (
        1.0 / jnp.sqrt(C_IN)
    )

    out = pointwise_conv(x, weight, stride=STRIDE)
    jax.block_until_ready(out)

    # Reference: plain-JAX einsum equivalent of the strided 1x1 conv.
    x_s = x[:, :, ::STRIDE, ::STRIDE]
    ref = jnp.einsum("nchw,oc->nohw", x_s, weight.reshape(C_OUT, C_IN))
    assert out.shape == ref.shape == (N, C_OUT, H // STRIDE, W // STRIDE)
    assert jnp.allclose(out, ref, atol=1e-5, rtol=1e-5)

    # Also exercise stride=1 (the common pointwise-conv case: zero extra HBM passes).
    out1 = pointwise_conv(x, weight, stride=1)
    jax.block_until_ready(out1)
    ref1 = jnp.einsum("nchw,oc->nohw", x, weight.reshape(C_OUT, C_IN))
    assert jnp.allclose(out1, ref1, atol=1e-5, rtol=1e-5)

    print("KERNEL_OK")
</pallas_src>

<mosaic_0001>
module attributes {stable_mosaic.version = 11 : i64} {
  func.func @_pw_kernel_vpu(%arg0: i32, %arg1: i32, %arg2: memref<1x4x64xf32, #tpu.memory_space<vmem>>, %arg3: memref<8x4xf32, #tpu.memory_space<vmem>>, %arg4: memref<1x8x64xf32, #tpu.memory_space<vmem>>) attributes {dimension_semantics = [#tpu.dimension_semantics<parallel>, #tpu.dimension_semantics<parallel>], iteration_bounds = array<i64: 2, 1>, scalar_prefetch = 0 : i64, scratch_operands = 0 : i64, tpu.core_type = #tpu.core_type<tc>, window_params = [{transform_indices = @transform_0, window_bounds = array<i64: 1, 4, 64>}, {pipeline_mode = #tpu.pipeline_mode<synchronous>, transform_indices = @transform_1, window_bounds = array<i64: 8, 4>}, {transform_indices = @transform_2, window_bounds = array<i64: 1, 8, 64>}]} {
    %c0 = arith.constant 0 : index
    %c0_0 = arith.constant 0 : index
    %c0_1 = arith.constant 0 : index
    %0 = vector.load %arg2[%c0, %c0_0, %c0_1] : memref<1x4x64xf32, #tpu.memory_space<vmem>>, vector<1x4x64xf32>
    %1 = vector.shape_cast %0 : vector<1x4x64xf32> to vector<4x64xf32>
    %c0_2 = arith.constant 0 : index
    %c0_3 = arith.constant 0 : index
    %2 = vector.load %arg3[%c0_2, %c0_3] : memref<8x4xf32, #tpu.memory_space<vmem>>, vector<8x4xf32>
    %3 = vector.extract_strided_slice %2 {offsets = [0, 0], sizes = [8, 1], strides = [1, 1]} : vector<8x4xf32> to vector<8x1xf32>
    %4 = vector.extract_strided_slice %1 {offsets = [0, 0], sizes = [1, 64], strides = [1, 1]} : vector<4x64xf32> to vector<1x64xf32>
    %5 = vector.broadcast %3 : vector<8x1xf32> to vector<8x64xf32>
    %6 = vector.broadcast %4 : vector<1x64xf32> to vector<8x64xf32>
    %7 = arith.mulf %5, %6 : vector<8x64xf32>
    %8 = vector.extract_strided_slice %2 {offsets = [0, 1], sizes = [8, 1], strides = [1, 1]} : vector<8x4xf32> to vector<8x1xf32>
    %9 = vector.extract_strided_slice %1 {offsets = [1, 0], sizes = [1, 64], strides = [1, 1]} : vector<4x64xf32> to vector<1x64xf32>
    %10 = vector.broadcast %8 : vector<8x1xf32> to vector<8x64xf32>
    %11 = vector.broadcast %9 : vector<1x64xf32> to vector<8x64xf32>
    %12 = arith.mulf %10, %11 : vector<8x64xf32>
    %13 = arith.addf %7, %12 : vector<8x64xf32>
    %14 = vector.extract_strided_slice %2 {offsets = [0, 2], sizes = [8, 1], strides = [1, 1]} : vector<8x4xf32> to vector<8x1xf32>
    %15 = vector.extract_strided_slice %1 {offsets = [2, 0], sizes = [1, 64], strides = [1, 1]} : vector<4x64xf32> to vector<1x64xf32>
    %16 = vector.broadcast %14 : vector<8x1xf32> to vector<8x64xf32>
    %17 = vector.broadcast %15 : vector<1x64xf32> to vector<8x64xf32>
    %18 = arith.mulf %16, %17 : vector<8x64xf32>
    %19 = arith.addf %13, %18 : vector<8x64xf32>
    %20 = vector.extract_strided_slice %2 {offsets = [0, 3], sizes = [8, 1], strides = [1, 1]} : vector<8x4xf32> to vector<8x1xf32>
    %21 = vector.extract_strided_slice %1 {offsets = [3, 0], sizes = [1, 64], strides = [1, 1]} : vector<4x64xf32> to vector<1x64xf32>
    %22 = vector.broadcast %20 : vector<8x1xf32> to vector<8x64xf32>
    %23 = vector.broadcast %21 : vector<1x64xf32> to vector<8x64xf32>
    %24 = arith.mulf %22, %23 : vector<8x64xf32>
    %25 = arith.addf %19, %24 : vector<8x64xf32>
    %c0_4 = arith.constant 0 : index
    %c0_5 = arith.constant 0 : index
    %c0_6 = arith.constant 0 : index
    %26 = vector.load %arg4[%c0_4, %c0_5, %c0_6] : memref<1x8x64xf32, #tpu.memory_space<vmem>>, vector<1x8x64xf32>
    %27 = vector.shape_cast %26 : vector<1x8x64xf32> to vector<8x64xf32>
    %28 = vector.shape_cast %25 : vector<8x64xf32> to vector<1x8x64xf32>
    tpu.vector_store %arg4[%c0_4, %c0_5, %c0_6], %28 {strides = array<i32>} : memref<1x8x64xf32, #tpu.memory_space<vmem>>, vector<1x8x64xf32>,
    return
  }
  func.func @transform_0(%arg0: i32, %arg1: i32) -> (i32, i32, i32) {
    %c0_i32 = arith.constant 0 : i32
    %c0_i32_0 = arith.constant 0 : i32
    return %arg0, %c0_i32, %arg1 : i32, i32, i32
  }
  func.func @transform_1(%arg0: i32, %arg1: i32) -> (i32, i32) {
    %c0_i32 = arith.constant 0 : i32
    %c0_i32_0 = arith.constant 0 : i32
    %c0_i32_1 = arith.constant 0 : i32
    return %c0_i32, %c0_i32_0 : i32, i32
  }
  func.func @transform_2(%arg0: i32, %arg1: i32) -> (i32, i32, i32) {
    %c0_i32 = arith.constant 0 : i32
    %c0_i32_0 = arith.constant 0 : i32
    return %arg0, %c0_i32, %arg1 : i32, i32, i32
  }
}

</mosaic_0001>

<bundles_post_ra>
// kernel: tpu_custom_call.1
= control target key start
LH: loop header
LB: loop body
LE: loop exit
PB: predicated region body
PF: predicated region fallthrough
CT: control target
= control target key end

     0   :  { %7 = vsyncpa [#allocation3], 0  ;;  %s584_s0 = inlined_call_operand.vmem [shape: f32[2,4,64], index: 0, kind: input, shape index: {}]   ;;  %s585_s1 = inlined_call_operand.vmem [shape: f32[8,4], index: 1, kind: input, shape index: {}]   ;;  %s586_s2 = inlined_call_operand.hbm [shape: f32[2,8,64], index: 2, kind: output, shape index: {}]  }
   0x1   :  { %9 = vsyncpa [#allocation3 + $0x1], 0  ;;  %s469_s9 = smov 0   ;;  %s471_s10 = smov 0  }
   0x2   :  { %s473_s11 = smov 0   ;;  %s475_s12 = smov 0  }
   0x3   :  { %s477_s13 = smov 0   ;;  %s479_s14 = smov 0  }
   0x4 LB: > { %s294_s15 = sadd.s32 4294967295, %s447_s14   ;;  %s295_s16 = sadd.s32 4294967294, %s447_s14   ;;  %s447_s14 = sphi %s479_s14, %s15_s14   ;;  %s443_s13 = sphi %s477_s13, %s593_s13   ;;  %s439_s12 = sphi %s475_s12, %s592_s12   ;;  %s435_s11 = sphi %s473_s11, %s591_s11   ;;  %s431_s10 = sphi %s471_s10, %s590_s10   ;;  %s427_s9 = sphi %s469_s9, %s589_s9  }
   0x5   : > { %s27_s17 = sadd.s32 1, %s443_s13  ;;  %s85_s18 = sadd.s32 1, %s435_s11 }
   0x6   : > { %p29_p0 = scmp.ge.s32.totalorder %s27_s17, 2  ;;  %p95_p1 = scmp.ne.s32.totalorder %s435_s11, %s431_s10 }
   0x7   : > { %p96_p2 = scmp.eq.s32.totalorder %s294_s15, 1  ;;  %p101_p3 = scmp.ne.s32.totalorder %s431_s10, %s427_s9 }
   0x8   : > { %s595_s17 = smov (%p29_p0, %s27_s17), 0  ;;  %p102_p5 = scmp.eq.s32.totalorder %s295_s16, 1 }
   0x9   : > { %p509_p4 = por %p96_p2, %p95_p1  ;;  %s80_s20 = ssub.s32 %s443_s13, %s595_s17 }
   0xa   : > { %p298_p6 = scmp.ge.s32.totalorder %s447_s14, 1  ;;  %p83_p7 = scmp.eq.s32.totalorder %s80_s20, 0 }
   0xb   : > { %p516_p8 = por %p102_p5, %p101_p3  ;;  %p133_p9 = scmp.lt.s32.totalorder %s447_s14, 3 }
   0xc   : > { %s522_s22 = scalar_select %p83_p7, %s435_s11, %s85_s18  }
   0xd   : > { %p134_p10 = pnand %p298_p6, %p133_p9 }
   0xe   : > { %v165_v0 = vld [vmem:[%s585_s1] sm:$0xff] (!%p134_p10)  ;;  %v449_v1 = vmov (!%p134_p10), 0   ;;  %v450_v2 = vmov (!%p134_p10), 2   ;;  %v451_v3 = vmov (!%p134_p10), 1   ;;  %v452_v4 = vmov (!%p134_p10), 3   ;;  %p157_p11 = scmp.lt.s32.totalorder (!%p134_p10), %s439_s12, 1 }
   0xf   : > { %137 = sbr.rel (%p134_p10) target bundleno = 171 (0xab), region = 28  ;;  %364 = vset.pattern.permute.xlu0 (!%p134_p10), %v449_v1  ;;  %366 = vset.pattern.permute.xlu1 (!%p134_p10), %v450_v2  ;;  %v171_v5 = vlaneseq (!%p134_p10)  ;;  %s154_s30 = sand.u32 (!%p134_p10), 1, %s431_s10   ;;  %vm206_vm0 = vcmask (!%p134_p10), 523264  }
  0x10   : > { %168 = vperm.xlu0 (!%p134_p10), %364, %v165_v0   ;;  %187 = vperm.xlu1 (!%p134_p10), %366, %v165_v0   ;;  %s299_s3 = sshll.u32 (!%p134_p10), %s154_s30, 3  ;;  %s302_s4 = sshll.u32 (!%p134_p10), %s439_s12, 7 }
  0x11   : > { %v172_v6 = vshrl.u32 (!%p134_p10), %v171_v5, 7  ;;  %s156_s5 = scalar_lea.vmem (!%p134_p10), [#allocation2], %s299_s3  ;;  %s537_s15 = scalar_lea.hbm (!%p134_p10), %s586_s2, %s302_s4 }
  0x12   : > { %s223_s6 = sshll.u32 (!%p134_p10), %s156_s5, 4  ;;  %s209_s16 = scalar_lea.sflag (!%p134_p10), [#allocation3], %s154_s30  ;;  %s539_s6 = int_to_ptr.vmem [resolvable:$true] %s223_s6 }
  0x13   : > { %v173_v7 = vsub.s32 (!%p134_p10), 0, %v172_v6  ;;  %v182_v8 = vsub.s32 (!%p134_p10), 1, %v172_v6  ;;  %v192_v11 = vsub.s32 (!%p134_p10), 2, %v172_v6  ;;  %v202_v13 = vsub.s32 (!%p134_p10), 3, %v172_v6  ;;  %s369_s18 = scalar_lea.vmem (!%p134_p10), %s539_s6, 128 }
  0x14   : > { %365 = vset.pattern.permute.xlu0 (!%p134_p10), %v451_v3  ;;  %367 = vset.pattern.permute.xlu1 (!%p134_p10), %v452_v4  ;;  %p370_p12 = scmp.ne.s32.totalorder (!%p134_p10), %s539_s6, %s369_s18 }
  0x15   : > { %177 = vperm.xlu0 (!%p134_p10), %365, %v165_v0   ;;  %197 = vperm.xlu1 (!%p134_p10), %367, %v165_v0  }
  0x16   : > { %s158_s25 = scalar_select %p157_p11, %s439_s12, 1 }
  0x17   : > { %p371_p13 = pnand %p370_p12, %p509_p4  ;;  %s453_s12 = smov [#allocation2]  }
  0x18   : > { %s300_s26 = sshll.u32 %s158_s25, 2  ;;  %s373_s20 = sshll.u32 %s453_s12, 4  ;;  %s374_s20 = int_to_ptr.vmem [resolvable:$false] %s373_s20 }
  0x19   : > { %368 = vset.pattern.permute.xlu0 %v452_v4  ;;  %s163_s29 = scalar_lea.vmem %s584_s0, %s300_s26  ;;  %p372_p0 = pneg %p371_p13 }
  0x1a   : > { %v164_v9 = vld [vmem:[%s163_s29] sm:$0xf]  ;;  %s375_s23 = scalar_lea.vmem %s374_s20, 256  ;;  %p376_p1 = scmp.lt.s32.totalorder %s539_s6, %s374_s20 }
  0x1b   : > { %v174_v14 = vrot.slane %v164_v9, %v173_v7  ;;  %v183_v15 = vrot.slane %v164_v9, %v182_v8  ;;  %v193_v16 = vrot.slane %v164_v9, %v192_v11  ;;  %v203_v17 = vrot.slane %v164_v9, %v202_v13  ;;  %p377_p2 = scmp.lt.s32.totalorder %s375_s23, %s369_s18 }
  0x1d   : > { %p378_p3 = por %p377_p2, %p376_p1 }
  0x1f   : > { %p379_p5 = pnand %p378_p3, %p372_p0 }
  0x8f   : > { %v169_v10 = vpop.permute.xlu0 %168  ;;  %v188_v12 = vpop.permute.xlu1 %187 }
  0x90   : > { %v175_v20 = vmul.f32 %v174_v14, %v169_v10  ;;  %v194_v22 = vmul.f32 %v193_v16, %v188_v12 }
  0x94   : > { %v178_v18 = vpop.permute.xlu0 %177  ;;  %v198_v19 = vpop.permute.xlu1 %197 }
  0x95   : > { %v184_v21 = vmul.f32 %v183_v15, %v178_v18  ;;  %v204_v24 = vmul.f32 %v203_v17, %v198_v19 }
  0x97   : > { %v185_v23 = vadd.f32 %v184_v21, %v175_v20 }
  0x99   : > { %v195_v25 = vadd.f32 %v194_v22, %v185_v23 }
  0x9b   : > { %v205_v26 = vadd.f32 %v204_v24, %v195_v25 }
  0x9d   : > { %207 = vst.msk [vmem:[%s156_s5] sm:$0xff] %vm206_vm0, %v205_v26 }
  0x9e   : > { %382 = shalt.err (!%p379_p5)
}
  0x9f   : > { %s383_s24 = scalar_lea.hbm %s537_s15, 128  ;;  %s387_s27 = scalar_lea.hbm %s586_s2, 256 }
  0xa0   : > { %p384_p6 = scmp.ne.s32.totalorder %s537_s15, %s383_s24  ;;  %p388_p10 = scmp.lt.u32.totalorder %s537_s15, %s586_s2 }
  0xa1   : > { %p389_p11 = scmp.lt.u32.totalorder %s387_s27, %s383_s24  ;;  %p391_p13 = scmp.lt.u32.totalorder %s383_s24, %s537_s15 }
  0xa2   : > { %p385_p7 = pnand %p384_p6, %p509_p4 }
  0xa3   : > { %p390_p12 = por %p389_p11, %p388_p10 }
  0xa4   : > { %p386_p9 = pneg %p385_p7 }
  0xa5   : > { %p392_p0 = por %p391_p13, %p390_p12 }
  0xa7   : > { %p393_p1 = pnand %p392_p0, %p386_p9 }
  0xa9   : > { %396 = shalt.err (!%p393_p1)
}
  0xaa   : > { %305 = dma.vmem_to_hbm [thread:$0]  (%p509_p4), %s539_s6, 128, %s537_s15, %s209_s16  }
  0xab PF: > { %p311_p2 = scmp.ge.s32.totalorder %s447_s14, 2  ;;  %s235_s30 = sand.u32 1, %s427_s9  }
  0xac   : > { %s236_s3 = scalar_lea.sflag [#allocation3], %s235_s30 }
  0xad   : > { %p308_p3 = pnand %p311_p2, %p516_p8 }
  0xaf   : > { %422 = dma.done.wait (!%p308_p3), %s236_s3, 128  }
  0xb0   : > { %424 = vsyncadd (!%p308_p3), %s236_s3, 4294967168  ;;  %s15_s14 = sadd.s32 1, %s447_s14   ;;  %s589_s9 = smov %s431_s10 }
  0xb1   : > { %p12_p5 = scmp.ge.s32.totalorder %s15_s14, 4   ;;  %s590_s10 = smov %s435_s11 }
  0xb2   : > { %s591_s11 = smov %s522_s22  ;;  %s592_s12 = smov %s443_s13 }
  0xb3   : > { %s593_s13 = smov %s595_s17  ;;  %14 = sbr.rel (!%p12_p5) target bundleno = 4 (0x4), region = 63 }
  0xba   :  { %241 = vsyncpa [#allocation3], 1 }
  0xbb   :  { %243 = vsyncpa [#allocation3 + $0x1], 1 }

</bundles_post_ra>
